<compile_context>
chip_gen: v5e
topology: v5e:2x2
jax: 0.10.0
libtpu: 0.0.40
codegen_flags: <defaults>
</compile_context>

<pallas_src>
import jax
import jax.numpy as jnp
from jax.experimental import pallas as pl
from jax.experimental.pallas import tpu as pltpu


_MAX_TILE_ROWS = 1024   # 1024 rows x 128 lanes x 4 B = 512 KiB per f32 input tile


def _dice_mse_partials_kernel(img_ref, pred_ref, rec_ref, tgt_ref, out_ref):
    """Accumulates per-sample partial reductions into the resident output block.

    Output block layout (1, 4, 8, 128) f32 vreg accumulators:
      [0] sum((image - reconstruction)^2)
      [1] sum(prediction * seg_target)
      [2] sum(prediction)
      [3] sum(seg_target)
    """
    r = pl.program_id(1)

    @pl.when(r == 0)
    def _():
        out_ref[...] = jnp.zeros_like(out_ref)

    img = img_ref[0].astype(jnp.float32)     # (TILE_R, 128)
    rec = rec_ref[0].astype(jnp.float32)
    pred = pred_ref[0].astype(jnp.float32)
    tgt = tgt_ref[0].astype(jnp.float32)

    tr = img.shape[0]
    diff = img - rec
    # (TILE_R,128) -> (TILE_R//8, 8, 128) keeps (8,128) vreg tiles intact; the reduction
    # over the leading axis is pure VPU vreg adds (no XLU / scalar collapse per step).
    out_ref[0, 0, :, :] = out_ref[0, 0, :, :] + jnp.sum(
        (diff * diff).reshape(tr // 8, 8, 128), axis=0)
    out_ref[0, 1, :, :] = out_ref[0, 1, :, :] + jnp.sum(
        (pred * tgt).reshape(tr // 8, 8, 128), axis=0)
    out_ref[0, 2, :, :] = out_ref[0, 2, :, :] + jnp.sum(
        pred.reshape(tr // 8, 8, 128), axis=0)
    out_ref[0, 3, :, :] = out_ref[0, 3, :, :] + jnp.sum(
        tgt.reshape(tr // 8, 8, 128), axis=0)


def _sublane_align(dtype) -> int:
    # f32 -> 8 sublanes, bf16 -> 16, int8/fp8 -> 32 (packed sublane tiling).
    return max(8, 32 // jnp.dtype(dtype).itemsize)


def _to_lane_tiles(x, rows_padded):
    """Flatten each sample to a lane-dense (rows_padded, 128) slab, zero-padding the tail."""
    b = x.shape[0]
    n = int(x.size) // b
    flat = x.reshape(b, n)             # row-major reshape: no relayout for contiguous inputs
    total = rows_padded * 128
    if total != n:
        flat = jnp.pad(flat, ((0, 0), (0, total - n)))   # zeros are reduction-neutral here
    return flat.reshape(b, rows_padded, 128)


def dice_mse_loss(image, prediction, reconstruction, seg_target, seg_wt=1.0):
    """Pallas implementation of DiceMSELoss.forward. Inputs are NCDHW 5-D arrays."""
    B = image.shape[0]
    assert prediction.shape[0] == B and seg_target.shape[0] == B
    assert reconstruction.shape == image.shape
    assert seg_target.shape == prediction.shape

    n_img = int(image.size) // B
    n_seg = int(prediction.size) // B

    inputs = (image, prediction, reconstruction, seg_target)
    align = max(_sublane_align(x.dtype) for x in inputs)
    rows_needed = pl.cdiv(max(n_img, n_seg), 128)
    tile_r = min(_MAX_TILE_ROWS, ((rows_needed + align - 1) // align) * align)
    tile_r = max(align, (tile_r // align) * align)
    rows_padded = ((rows_needed + tile_r - 1) // tile_r) * tile_r
    row_tiles = rows_padded // tile_r

    img2 = _to_lane_tiles(image, rows_padded)
    pred2 = _to_lane_tiles(prediction, rows_padded)
    rec2 = _to_lane_tiles(reconstruction, rows_padded)
    tgt2 = _to_lane_tiles(seg_target, rows_padded)

    # Explicit VMEM budget: double-buffered input tiles + output/headroom, capped at 32 MiB
    # so the same tiling is safe on v7x (64 MiB physical / 32 MiB default scoped).
    tile_bytes = sum(tile_r * 128 * jnp.dtype(x.dtype).itemsize
                     for x in (img2, pred2, rec2, tgt2))
    vmem_limit = int(min(max(2 * tile_bytes + (4 << 20), 8 << 20), 32 << 20))

    in_block = lambda: pl.BlockSpec((1, tile_r, 128), lambda b, r: (b, r, 0))

    partials = pl.pallas_call(
        _dice_mse_partials_kernel,
        out_shape=jax.ShapeDtypeStruct((B, 4, 8, 128), jnp.float32),
        grid_spec=pltpu.PrefetchScalarGridSpec(
            num_scalar_prefetch=0,
            grid=(B, row_tiles),                       # row (reduction) axis innermost
            in_specs=[in_block(), in_block(), in_block(), in_block()],
            out_specs=pl.BlockSpec((1, 4, 8, 128), lambda b, r: (b, 0, 0, 0)),
        ),
        compiler_params=pltpu.CompilerParams(
            dimension_semantics=("parallel", "arbitrary"),
            vmem_limit_bytes=vmem_limit),
    )(img2, pred2, rec2, tgt2)

    # Tiny epilogue on per-sample partials (outside the kernel so the seg mask sees the
    # complete per-sample t_sum and the batch grid axis stays megacore-parallel).
    per_sample = jnp.sum(partials, axis=(2, 3))        # (B, 4)
    sse = per_sample[:, 0]
    inter = per_sample[:, 1]
    psum = per_sample[:, 2]
    tsum = per_sample[:, 3]

    mse = jnp.sum(sse) / jnp.float32(B * n_img)
    mask = tsum != 0.0
    eps = jnp.float32(jnp.finfo(jnp.float32).eps)
    inter_m = jnp.sum(jnp.where(mask, inter, 0.0))
    denom_m = jnp.sum(jnp.where(mask, psum + tsum, 0.0))
    dice = jnp.float32(seg_wt) * (1.0 - (2.0 * inter_m + eps) / (denom_m + eps))
    dice_loss = jnp.where(jnp.any(mask), dice, jnp.float32(0.0))
    return dice_loss + jnp.float32(1.0 - seg_wt) * mse


def _reference(image, prediction, reconstruction, seg_target, seg_wt):
    """Pure-JAX reference mirroring the PyTorch forward."""
    mse = jnp.mean((image - reconstruction) ** 2)
    tsum_per = seg_target.sum(axis=(1, 2, 3, 4))
    mask = tsum_per != 0.0
    m = mask[:, None, None, None, None].astype(jnp.float32)
    inter = jnp.sum(m * prediction * seg_target)
    psum = jnp.sum(m * prediction)
    tsum = jnp.sum(m * seg_target)
    eps = jnp.finfo(jnp.float32).eps
    dice = seg_wt * (1.0 - (2.0 * inter + eps) / (psum + tsum + eps))
    dice = jnp.where(mask.sum() > 0, dice, 0.0)
    return dice + (1.0 - seg_wt) * mse


if __name__ == "__main__":
    key = jax.random.PRNGKey(0)
    k1, k2, k3, k4 = jax.random.split(key, 4)

    ok = True

    # Case 1: lane-aligned NCDHW volumes; sample 0 has segmentation, sample 1 is empty.
    B, C, D, H, W = 2, 1, 4, 8, 128
    image = jax.random.normal(k1, (B, C, D, H, W), dtype=jnp.float32)
    reconstruction = jax.random.normal(k2, (B, C, D, H, W), dtype=jnp.float32)
    prediction = jax.nn.sigmoid(jax.random.normal(k3, (B, C, D, H, W), dtype=jnp.float32))
    seg0 = (jax.random.uniform(k4, (1, C, D, H, W)) > 0.5).astype(jnp.float32)
    seg_target = jnp.concatenate([seg0, jnp.zeros((1, C, D, H, W), jnp.float32)], axis=0)
    seg_wt = 0.5   # exercises both loss terms

    out = jax.block_until_ready(
        dice_mse_loss(image, prediction, reconstruction, seg_target, seg_wt=seg_wt))
    ref = jax.block_until_ready(
        _reference(image, prediction, reconstruction, seg_target, seg_wt))
    ok &= bool(jnp.allclose(out, ref, rtol=1e-5, atol=1e-5))

    # Case 2: non-lane-aligned shape (exercises zero-padding) + all-empty seg targets
    # (exercises the "dice_loss = 0" branch).
    B2, C2, D2, H2, W2 = 3, 2, 3, 5, 7
    kk = jax.random.split(k1, 3)
    image2 = jax.random.normal(kk[0], (B2, C2, D2, H2, W2), dtype=jnp.float32)
    recon2 = jax.random.normal(kk[1], (B2, C2, D2, H2, W2), dtype=jnp.float32)
    pred2 = jax.nn.sigmoid(jax.random.normal(kk[2], (B2, C2, D2, H2, W2), dtype=jnp.float32))
    seg2 = jnp.zeros((B2, C2, D2, H2, W2), jnp.float32)

    out2 = jax.block_until_ready(
        dice_mse_loss(image2, pred2, recon2, seg2, seg_wt=seg_wt))
    ref2 = jax.block_until_ready(
        _reference(image2, pred2, recon2, seg2, seg_wt))
    ok &= bool(jnp.allclose(out2, ref2, rtol=1e-5, atol=1e-5))

    assert ok, (out, ref, out2, ref2)
    print("KERNEL_OK")
</pallas_src>

<mosaic_0001>
module attributes {stable_mosaic.version = 11 : i64} {
  func.func @_dice_mse_partials_kernel(%arg0: i32, %arg1: i32, %arg2: memref<1x32x128xf32, #tpu.memory_space<vmem>>, %arg3: memref<1x32x128xf32, #tpu.memory_space<vmem>>, %arg4: memref<1x32x128xf32, #tpu.memory_space<vmem>>, %arg5: memref<1x32x128xf32, #tpu.memory_space<vmem>>, %arg6: memref<1x4x8x128xf32, #tpu.memory_space<vmem>>) attributes {dimension_semantics = [#tpu.dimension_semantics<parallel>, #tpu.dimension_semantics<arbitrary>], iteration_bounds = array<i64: 2, 1>, scalar_prefetch = 0 : i64, scratch_operands = 0 : i64, tpu.core_type = #tpu.core_type<tc>, window_params = [{transform_indices = @transform_0, window_bounds = array<i64: 1, 32, 128>}, {transform_indices = @transform_1, window_bounds = array<i64: 1, 32, 128>}, {transform_indices = @transform_2, window_bounds = array<i64: 1, 32, 128>}, {transform_indices = @transform_3, window_bounds = array<i64: 1, 32, 128>}, {transform_indices = @transform_4, window_bounds = array<i64: 1, 4, 8, 128>}]} {
    %c0_i32 = arith.constant 0 : i32
    %0 = arith.cmpi eq, %arg1, %c0_i32 : i32
    %1 = arith.extui %0 : i1 to i32
    %c0_i32_0 = arith.constant 0 : i32
    %2 = arith.cmpi ne, %1, %c0_i32_0 : i32
    scf.if %2 {
      %cst_44 = arith.constant 0.000000e+00 : f32
      %46 = vector.broadcast %cst_44 : f32 to vector<1x4x8x128xf32>
      %c0_45 = arith.constant 0 : index
      %c0_46 = arith.constant 0 : index
      %c0_47 = arith.constant 0 : index
      %c0_48 = arith.constant 0 : index
      %47 = vector.load %arg6[%c0_45, %c0_46, %c0_47, %c0_48] : memref<1x4x8x128xf32, #tpu.memory_space<vmem>>, vector<1x4x8x128xf32>
      tpu.vector_store %arg6[%c0_45, %c0_46, %c0_47, %c0_48], %46 {strides = array<i32>} : memref<1x4x8x128xf32, #tpu.memory_space<vmem>>, vector<1x4x8x128xf32>,
    } else {
    }
    %c0 = arith.constant 0 : index
    %c0_1 = arith.constant 0 : index
    %c0_2 = arith.constant 0 : index
    %3 = vector.load %arg2[%c0, %c0_1, %c0_2] : memref<1x32x128xf32, #tpu.memory_space<vmem>>, vector<1x32x128xf32>
    %4 = vector.shape_cast %3 : vector<1x32x128xf32> to vector<32x128xf32>
    %c0_3 = arith.constant 0 : index
    %c0_4 = arith.constant 0 : index
    %c0_5 = arith.constant 0 : index
    %5 = vector.load %arg4[%c0_3, %c0_4, %c0_5] : memref<1x32x128xf32, #tpu.memory_space<vmem>>, vector<1x32x128xf32>
    %6 = vector.shape_cast %5 : vector<1x32x128xf32> to vector<32x128xf32>
    %c0_6 = arith.constant 0 : index
    %c0_7 = arith.constant 0 : index
    %c0_8 = arith.constant 0 : index
    %7 = vector.load %arg3[%c0_6, %c0_7, %c0_8] : memref<1x32x128xf32, #tpu.memory_space<vmem>>, vector<1x32x128xf32>
    %8 = vector.shape_cast %7 : vector<1x32x128xf32> to vector<32x128xf32>
    %c0_9 = arith.constant 0 : index
    %c0_10 = arith.constant 0 : index
    %c0_11 = arith.constant 0 : index
    %9 = vector.load %arg5[%c0_9, %c0_10, %c0_11] : memref<1x32x128xf32, #tpu.memory_space<vmem>>, vector<1x32x128xf32>
    %10 = vector.shape_cast %9 : vector<1x32x128xf32> to vector<32x128xf32>
    %11 = arith.subf %4, %6 : vector<32x128xf32>
    %c0_12 = arith.constant 0 : index
    %c0_13 = arith.constant 0 : index
    %c0_14 = arith.constant 0 : index
    %c0_15 = arith.constant 0 : index
    %12 = vector.load %arg6[%c0_12, %c0_13, %c0_14, %c0_15] : memref<1x4x8x128xf32, #tpu.memory_space<vmem>>, vector<1x1x8x128xf32>
    %13 = vector.shape_cast %12 : vector<1x1x8x128xf32> to vector<8x128xf32>
    %14 = arith.mulf %11, %11 : vector<32x128xf32>
    %15 = vector.shape_cast %14 : vector<32x128xf32> to vector<4x8x128xf32>
    %cst = arith.constant dense<0.000000e+00> : vector<8x128xf32>
    %16 = vector.multi_reduction <add>, %15, %cst [0] : vector<4x8x128xf32> to vector<8x128xf32>
    %17 = arith.addf %13, %16 : vector<8x128xf32>
    %c0_16 = arith.constant 0 : index
    %c0_17 = arith.constant 0 : index
    %c0_18 = arith.constant 0 : index
    %c0_19 = arith.constant 0 : index
    %18 = vector.load %arg6[%c0_16, %c0_17, %c0_18, %c0_19] : memref<1x4x8x128xf32, #tpu.memory_space<vmem>>, vector<1x1x8x128xf32>
    %19 = vector.shape_cast %18 : vector<1x1x8x128xf32> to vector<8x128xf32>
    %20 = vector.shape_cast %17 : vector<8x128xf32> to vector<1x1x8x128xf32>
    tpu.vector_store %arg6[%c0_16, %c0_17, %c0_18, %c0_19], %20 {strides = array<i32>} : memref<1x4x8x128xf32, #tpu.memory_space<vmem>>, vector<1x1x8x128xf32>,
    %c0_20 = arith.constant 0 : index
    %c1 = arith.constant 1 : index
    %c0_21 = arith.constant 0 : index
    %c0_22 = arith.constant 0 : index
    %21 = vector.load %arg6[%c0_20, %c1, %c0_21, %c0_22] : memref<1x4x8x128xf32, #tpu.memory_space<vmem>>, vector<1x1x8x128xf32>
    %22 = vector.shape_cast %21 : vector<1x1x8x128xf32> to vector<8x128xf32>
    %23 = arith.mulf %8, %10 : vector<32x128xf32>
    %24 = vector.shape_cast %23 : vector<32x128xf32> to vector<4x8x128xf32>
    %cst_23 = arith.constant dense<0.000000e+00> : vector<8x128xf32>
    %25 = vector.multi_reduction <add>, %24, %cst_23 [0] : vector<4x8x128xf32> to vector<8x128xf32>
    %26 = arith.addf %22, %25 : vector<8x128xf32>
    %c0_24 = arith.constant 0 : index
    %c1_25 = arith.constant 1 : index
    %c0_26 = arith.constant 0 : index
    %c0_27 = arith.constant 0 : index
    %27 = vector.load %arg6[%c0_24, %c1_25, %c0_26, %c0_27] : memref<1x4x8x128xf32, #tpu.memory_space<vmem>>, vector<1x1x8x128xf32>
    %28 = vector.shape_cast %27 : vector<1x1x8x128xf32> to vector<8x128xf32>
    %29 = vector.shape_cast %26 : vector<8x128xf32> to vector<1x1x8x128xf32>
    tpu.vector_store %arg6[%c0_24, %c1_25, %c0_26, %c0_27], %29 {strides = array<i32>} : memref<1x4x8x128xf32, #tpu.memory_space<vmem>>, vector<1x1x8x128xf32>,
    %c0_28 = arith.constant 0 : index
    %c2 = arith.constant 2 : index
    %c0_29 = arith.constant 0 : index
    %c0_30 = arith.constant 0 : index
    %30 = vector.load %arg6[%c0_28, %c2, %c0_29, %c0_30] : memref<1x4x8x128xf32, #tpu.memory_space<vmem>>, vector<1x1x8x128xf32>
    %31 = vector.shape_cast %30 : vector<1x1x8x128xf32> to vector<8x128xf32>
    %32 = vector.shape_cast %8 : vector<32x128xf32> to vector<4x8x128xf32>
    %cst_31 = arith.constant dense<0.000000e+00> : vector<8x128xf32>
    %33 = vector.multi_reduction <add>, %32, %cst_31 [0] : vector<4x8x128xf32> to vector<8x128xf32>
    %34 = arith.addf %31, %33 : vector<8x128xf32>
    %c0_32 = arith.constant 0 : index
    %c2_33 = arith.constant 2 : index
    %c0_34 = arith.constant 0 : index
    %c0_35 = arith.constant 0 : index
    %35 = vector.load %arg6[%c0_32, %c2_33, %c0_34, %c0_35] : memref<1x4x8x128xf32, #tpu.memory_space<vmem>>, vector<1x1x8x128xf32>
    %36 = vector.shape_cast %35 : vector<1x1x8x128xf32> to vector<8x128xf32>
    %37 = vector.shape_cast %34 : vector<8x128xf32> to vector<1x1x8x128xf32>
    tpu.vector_store %arg6[%c0_32, %c2_33, %c0_34, %c0_35], %37 {strides = array<i32>} : memref<1x4x8x128xf32, #tpu.memory_space<vmem>>, vector<1x1x8x128xf32>,
    %c0_36 = arith.constant 0 : index
    %c3 = arith.constant 3 : index
    %c0_37 = arith.constant 0 : index
    %c0_38 = arith.constant 0 : index
    %38 = vector.load %arg6[%c0_36, %c3, %c0_37, %c0_38] : memref<1x4x8x128xf32, #tpu.memory_space<vmem>>, vector<1x1x8x128xf32>
    %39 = vector.shape_cast %38 : vector<1x1x8x128xf32> to vector<8x128xf32>
    %40 = vector.shape_cast %10 : vector<32x128xf32> to vector<4x8x128xf32>
    %cst_39 = arith.constant dense<0.000000e+00> : vector<8x128xf32>
    %41 = vector.multi_reduction <add>, %40, %cst_39 [0] : vector<4x8x128xf32> to vector<8x128xf32>
    %42 = arith.addf %39, %41 : vector<8x128xf32>
    %c0_40 = arith.constant 0 : index
    %c3_41 = arith.constant 3 : index
    %c0_42 = arith.constant 0 : index
    %c0_43 = arith.constant 0 : index
    %43 = vector.load %arg6[%c0_40, %c3_41, %c0_42, %c0_43] : memref<1x4x8x128xf32, #tpu.memory_space<vmem>>, vector<1x1x8x128xf32>
    %44 = vector.shape_cast %43 : vector<1x1x8x128xf32> to vector<8x128xf32>
    %45 = vector.shape_cast %42 : vector<8x128xf32> to vector<1x1x8x128xf32>
    tpu.vector_store %arg6[%c0_40, %c3_41, %c0_42, %c0_43], %45 {strides = array<i32>} : memref<1x4x8x128xf32, #tpu.memory_space<vmem>>, vector<1x1x8x128xf32>,
    return
  }
  func.func @transform_0(%arg0: i32, %arg1: i32) -> (i32, i32, i32) {
    %c0_i32 = arith.constant 0 : i32
    %c0_i32_0 = arith.constant 0 : i32
    return %arg0, %arg1, %c0_i32 : i32, i32, i32
  }
  func.func @transform_1(%arg0: i32, %arg1: i32) -> (i32, i32, i32) {
    %c0_i32 = arith.constant 0 : i32
    %c0_i32_0 = arith.constant 0 : i32
    return %arg0, %arg1, %c0_i32 : i32, i32, i32
  }
  func.func @transform_2(%arg0: i32, %arg1: i32) -> (i32, i32, i32) {
    %c0_i32 = arith.constant 0 : i32
    %c0_i32_0 = arith.constant 0 : i32
    return %arg0, %arg1, %c0_i32 : i32, i32, i32
  }
  func.func @transform_3(%arg0: i32, %arg1: i32) -> (i32, i32, i32) {
    %c0_i32 = arith.constant 0 : i32
    %c0_i32_0 = arith.constant 0 : i32
    return %arg0, %arg1, %c0_i32 : i32, i32, i32
  }
  func.func @transform_4(%arg0: i32, %arg1: i32) -> (i32, i32, i32, i32) {
    %c0_i32 = arith.constant 0 : i32
    %c0_i32_0 = arith.constant 0 : i32
    %c0_i32_1 = arith.constant 0 : i32
    %c0_i32_2 = arith.constant 0 : i32
    return %arg0, %c0_i32, %c0_i32_0, %c0_i32_1 : i32, i32, i32, i32
  }
}

</mosaic_0001>

<bundles_post_ra>
// kernel: tpu_custom_call.1
= control target key start
LH: loop header
LB: loop body
LE: loop exit
PB: predicated region body
PF: predicated region fallthrough
CT: control target
= control target key end

     0   :  { %s1170_s0 = inlined_call_operand.hbm [shape: f32[2,32,128], index: 0, kind: input, shape index: {}]   ;;  %s1171_s1 = inlined_call_operand.hbm [shape: f32[2,32,128], index: 1, kind: input, shape index: {}]   ;;  %s1172_s2 = inlined_call_operand.hbm [shape: f32[2,32,128], index: 2, kind: input, shape index: {}]   ;;  %s1173_s3 = inlined_call_operand.hbm [shape: f32[2,32,128], index: 3, kind: input, shape index: {}]   ;;  %s1174_s4 = inlined_call_operand.hbm [shape: f32[2,4,8,128], index: 4, kind: output, shape index: {}]  }
   0x1   :  { %1180 = sst [smem:[#allocation20_spill]] %s1170_s0 }
   0x2   :  { %1181 = sst [smem:[#allocation21_spill]] %s1171_s1 }
   0x3   :  { %9 = vsyncpa [#allocation3], 0 }
   0x4   :  { %11 = vsyncpa [#allocation3 + $0x1], 0 }
   0x5   :  { %12 = vsyncpa [#allocation6], 0 }
   0x6   :  { %14 = vsyncpa [#allocation6 + $0x1], 0 }
   0x7   :  { %15 = vsyncpa [#allocation9], 0 }
   0x8   :  { %17 = vsyncpa [#allocation9 + $0x1], 0 }
   0x9   :  { %18 = vsyncpa [#allocation4], 0 }
   0xa   :  { %20 = vsyncpa [#allocation4 + $0x1], 0  ;;  %s972_s15 = smov 0   ;;  %s974_s16 = smov 0  }
   0xb   :  { %s976_s17 = smov 0   ;;  %s978_s18 = smov 0  }
   0xc   :  { %s980_s19 = smov 0   ;;  %s982_s20 = smov 0  }
   0xd LB: > { %1182 = sst [smem:[#allocation15_spill]] %s929_s17  ;;  %s1003_s21 = sadd.s32 4294967295, %s941_s20   ;;  %s941_s20 = sphi %s982_s20, %s26_s20   ;;  %s937_s19 = sphi %s980_s19, %s1199_s19   ;;  %s933_s18 = sphi %s978_s18, %s1198_s18   ;;  %s929_s17 = sphi %s976_s17, %s1197_s17   ;;  %s925_s16 = sphi %s974_s16, %s1201_s16   ;;  %s921_s15 = sphi %s972_s15, %s1200_s15  }
   0xe   : > { %1183 = sst [smem:[#allocation16_spill]] %s937_s19  ;;  %s612_s22 = sadd.s32 4294967294, %s941_s20  }
   0xf   : > { %1184 = sst [smem:[#allocation17_spill]] %s941_s20  ;;  %s38_s23 = sadd.s32 1, %s937_s19 }
  0x10   : > { %s47_s24 = sadd.s32 1, %s929_s17  ;;  %p40_p0 = scmp.ge.s32.totalorder %s38_s23, 2 }
  0x11   : > { %p54_p1 = scmp.ne.s32.totalorder %s929_s17, %s925_s16  ;;  %p55_p2 = scmp.eq.s32.totalorder %s941_s20, 0 }
  0x12   : > { %p60_p3 = scmp.ne.s32.totalorder %s925_s16, %s921_s15  ;;  %s1203_s23 = smov (%p40_p0, %s38_s23), 0 }
  0x13   : > { %1185 = sst [smem:[#allocation18_spill]] %s1203_s23  ;;  %p1015_p4 = por %p55_p2, %p54_p1 }
  0x14   : > { %p61_p5 = scmp.eq.s32.totalorder %s1003_s21, 0  ;;  %s42_s26 = ssub.s32 %s937_s19, %s1203_s23 }
  0x15   : > { %p168_p6 = scmp.eq.s32.totalorder %s1003_s21, 1  ;;  %p45_p7 = scmp.eq.s32.totalorder %s42_s26, 0 }
  0x16   : > { %p1023_p8 = por %p61_p5, %p60_p3  ;;  %p174_p10 = scmp.eq.s32.totalorder %s612_s22, 1 }
  0x17   : > { %p1027_p9 = por %p168_p6, %p54_p1  ;;  %p614_p12 = scmp.ge.s32.totalorder %s941_s20, 2 }
  0x18   : > { %s1032_s29 = scalar_select %p45_p7, %s929_s17, %s47_s24  }
  0x19   : > { %p1034_p11 = por %p174_p10, %p60_p3  ;;  %p676_p13 = scmp.lt.s32.totalorder %s941_s20, 2 }
  0x1a   : > { %1189 = sst [smem:[#allocation19_spill]] %s1032_s29  ;;  %s1041_s5 = sand.u32 1, %s929_s17  }
  0x1b   : > { %s1044_s6 = sshll.u32 %s1041_s5, 5  ;;  %s1047_s7 = sshll.u32 %s937_s19, 5 }
  0x1c   : > { %p1051_p0 = pnand %p676_p13, %p1015_p4  ;;  %s218_s9 = sand.u32 1, %s941_s20  }
  0x1d   : > { %s1192_s1 = sld [smem:[#allocation21_spill]]  ;;  %s222_s14 = scalar_lea.vmem [#allocation5], %s1044_s6 }
  0x1e   : > { %s232_s22 = sshll.u32 %s222_s14, 4  ;;  %s219_s24 = scalar_lea.sflag [#allocation6], %s218_s9  ;;  %s233_s22 = int_to_ptr.vmem [resolvable:$true] %s232_s22 }
  0x1f   : > { %s943_s25 = smov 128   ;;  %s944_s26 = smov 8  }
  0x20   : > { %p627_p1 = scmp.ge.s32.totalorder %s941_s20, 1  ;;  %p288_p2 = scmp.lt.s32.totalorder %s941_s20, 3 }
  0x21   : > { %s1194_s0 = sld [smem:[#allocation20_spill]]  ;;  %s253_s11 = scalar_lea.hbm %s1172_s2, %s1047_s7 }
  0x22   : > { %p1068_p3 = pnand %p627_p1, %p288_p2  ;;  %s277_s17 = scalar_lea.hbm %s1173_s3, %s1047_s7 }
  0x23   : > { %s229_s12 = scalar_lea.hbm %s1192_s1, %s1047_s7  ;;  %s198_s1 = scalar_lea.vmem [#allocation2], %s1044_s6 }
  0x24   : > { %s230_s13 = sshll.u32 %s229_s12, 4  ;;  %s208_s23 = sshll.u32 %s198_s1, 4  ;;  %s231_s13 = int_to_ptr.hbm [resolvable:$true] %s230_s13  ;;  %s209_s23 = int_to_ptr.vmem [resolvable:$true] %s208_s23 }
  0x25   : > { %665 = dma.hbm_to_vmem [thread:$0]  (!%p1051_p0), %s231_s13, 512, %s233_s22, %s219_s24, %s943_s25, %s943_s25, %s944_s26  }
  0x26   : > { %s195_s13 = scalar_lea.sflag [#allocation3], %s1041_s5  ;;  %s254_s12 = sshll.u32 %s253_s11, 4  ;;  %s255_s12 = int_to_ptr.hbm [resolvable:$true] %s254_s12 }
  0x27   : > { %s205_s9 = scalar_lea.hbm %s1194_s0, %s1047_s7  ;;  %s246_s0 = scalar_lea.vmem [#allocation7], %s1044_s6 }
  0x28   : > { %s206_s14 = sshll.u32 %s205_s9, 4  ;;  %s256_s29 = sshll.u32 %s246_s0, 4  ;;  %s207_s14 = int_to_ptr.hbm [resolvable:$true] %s206_s14  ;;  %s257_s29 = int_to_ptr.vmem [resolvable:$true] %s256_s29 }
  0x29   : > { %662 = dma.hbm_to_vmem [thread:$0]  (!%p1051_p0), %s207_s14, 512, %s209_s23, %s195_s13, %s943_s25, %s943_s25, %s944_s26  }
  0x2a   : > { %668 = dma.hbm_to_vmem [thread:$0]  (!%p1051_p0), %s255_s12, 512, %s257_s29, %s219_s24, %s943_s25, %s943_s25, %s944_s26  }
  0x2b   : > { %s270_s20 = scalar_lea.vmem [#allocation8], %s1044_s6  ;;  %s278_s14 = sshll.u32 %s277_s17, 4  ;;  %s279_s14 = int_to_ptr.hbm [resolvable:$true] %s278_s14 }
  0x2c   : > { %s280_s23 = sshll.u32 %s270_s20, 4  ;;  %s267_s19 = scalar_lea.sflag [#allocation9], %s1041_s5  ;;  %s281_s23 = int_to_ptr.vmem [resolvable:$true] %s280_s23 }
  0x2d   : > { %671 = dma.hbm_to_vmem [thread:$0]  (!%p1051_p0), %s279_s14, 512, %s281_s23, %s267_s19, %s943_s25, %s943_s25, %s944_s26  }
  0x2e   : > { %292 = sbr.rel (%p1068_p3) target bundleno = 77 (0x4d), region = 36  ;;  %s1107_s0 = sand.u32 (!%p1068_p3), 1, %s925_s16  }
  0x2f   : > { %s1110_s29 = sshll.u32 (!%p1068_p3), %s1107_s0, 5  ;;  %s295_s17 = scalar_lea.sflag (!%p1068_p3), [#allocation3], %s1107_s0 }
  0x30   : > { %s298_s20 = scalar_lea.vmem (!%p1068_p3), [#allocation2], %s1110_s29 }
  0x33   : > { %904 = dma.done.wait (%p1023_p8), %s295_s17, 512  }
  0x34   : > { %906 = vsyncadd (%p1023_p8), %s295_s17, 4294966784  ;;  %s304_s5 = sand.u32 1, %s1003_s21   ;;  %s308_s7 = scalar_lea.vmem [#allocation5], %s1110_s29 }
  0x35   : > { %s305_s6 = scalar_lea.sflag [#allocation6], %s304_s5 }
  0x36   : > { %908 = dma.done.wait (%p1023_p8), %s305_s6, 1024  }
  0x37   : > { %910 = vsyncadd (%p1023_p8), %s305_s6, 4294966272  ;;  %s318_s8 = scalar_lea.vmem [#allocation7], %s1110_s29  ;;  %s325_s24 = scalar_lea.sflag [#allocation9], %s1107_s0 }
  0x38   : > { %s328_s25 = scalar_lea.vmem [#allocation8], %s1110_s29 }
  0x39   : > { %912 = dma.done.wait (%p1023_p8), %s325_s24, 512  }
  0x3a   : > { %914 = vsyncadd (%p1023_p8), %s325_s24, 4294966784  ;;  %v381_v0 = vld [vmem:[%s298_s20] sm:$0xff]  ;;  %v382_v1 = vld [vmem:[%s298_s20 + $0x8] sm:$0xff]  ;;  %s648_s21 = sshll.u32 %s933_s18, 5  ;;  %s368_s13 = scalar_lea.vmem [#allocation10], %s1110_s29 }
  0x3b   : > { %v383_v2 = vld [vmem:[%s298_s20 + $0x10] sm:$0xff]  ;;  %v384_v3 = vld [vmem:[%s298_s20 + $0x18] sm:$0xff]  ;;  %v385_v4 = vld [vmem:[%s318_s8] sm:$0xff]  ;;  %s448_s10 = scalar_lea.hbm %s1174_s4, %s648_s21  ;;  %s449_s18 = sshll.u32 %s368_s13, 4  ;;  %s450_s18 = int_to_ptr.vmem [resolvable:$true] %s449_s18 }
  0x3c   : > { %v386_v5 = vld [vmem:[%s318_s8 + $0x8] sm:$0xff]  ;;  %v387_v6 = vld [vmem:[%s318_s8 + $0x10] sm:$0xff]  ;;  %v388_v7 = vld [vmem:[%s318_s8 + $0x18] sm:$0xff]  ;;  %v397_v8 = vsub.f32 %v381_v0, %v385_v4  ;;  %s451_s22 = sshll.u32 %s448_s10, 4  ;;  %s437_s11 = scalar_lea.sflag [#allocation4], %s1107_s0  ;;  %s452_s22 = int_to_ptr.hbm [resolvable:$true] %s451_s22 }
  0x3d   : > { %v398_v9 = vsub.f32 %v382_v1, %v386_v5  ;;  %v389_v10 = vld [vmem:[%s308_s7] sm:$0xff]  ;;  %v399_v11 = vsub.f32 %v383_v2, %v387_v6  ;;  %v400_v12 = vsub.f32 %v384_v3, %v388_v7  ;;  %v390_v13 = vld [vmem:[%s308_s7 + $0x8] sm:$0xff]  ;;  %v391_v14 = vld [vmem:[%s308_s7 + $0x10] sm:$0xff]  ;;  %s865_s12 = sshra.s32 %s452_s22, 4  ;;  %s871_s14 = scalar_lea.hbm %s1174_s4, 64  ;;  %s866_s12 = int_to_ptr.hbm [resolvable:$true] %s865_s12 }
  0x3e   : > { %v392_v15 = vld [vmem:[%s308_s7 + $0x18] sm:$0xff]  ;;  %v402_v16 = vmul.f32 %v397_v8, %v397_v8  ;;  %v393_v18 = vld [vmem:[%s328_s25] sm:$0xff]  ;;  %v394_v19 = vld [vmem:[%s328_s25 + $0x8] sm:$0xff]  ;;  %v424_v21 = vadd.f32 %v390_v13, %v389_v10  ;;  %s867_s1 = scalar_lea.hbm %s866_s12, 32  ;;  %p872_p7 = scmp.lt.s32.totalorder %s866_s12, %s1174_s4 }
  0x3f   : > { %v403_v17 = vmul.f32 %v398_v9, %v398_v9  ;;  %v395_v20 = vld [vmem:[%s328_s25 + $0x10] sm:$0xff]  ;;  %v404_v22 = vmul.f32 %v399_v11, %v399_v11  ;;  %v396_v23 = vld [vmem:[%s328_s25 + $0x18] sm:$0xff]  ;;  %v413_v24 = vmul.f32 %v393_v18, %v389_v10  ;;  %v414_v25 = vmul.f32 %v394_v19, %v390_v13  ;;  %p868_p4 = scmp.ne.s32.totalorder %s866_s12, %s867_s1  ;;  %p873_p8 = scmp.lt.s32.totalorder %s871_s14, %s867_s1 }
  0x40   : > { %v405_v26 = vmul.f32 %v400_v12, %v400_v12  ;;  %v415_v28 = vmul.f32 %v395_v20, %v391_v14  ;;  %v425_v29 = vadd.f32 %v424_v21, %v391_v14  ;;  %v416_v30 = vmul.f32 %v396_v23, %v392_v15 }
  0x41   : > { %v406_v27 = vadd.f32 %v403_v17, %v402_v16  ;;  %v417_v31 = vadd.f32 %v414_v25, %v413_v24  ;;  %v431_v32 = vadd.f32 %v394_v19, %v393_v18  ;;  %p869_p5 = pnand %p868_p4, %p1027_p9  ;;  %p874_p10 = por %p873_p8, %p872_p7 }
  0x42   : > { %v426_v34 = vadd.f32 %v425_v29, %v392_v15 }
  0x43   : > { %v407_v33 = vadd.f32 %v406_v27, %v404_v22  ;;  %v418_v35 = vadd.f32 %v417_v31, %v415_v28  ;;  %v432_v36 = vadd.f32 %v431_v32, %v395_v20  ;;  %p870_p6 = pneg %p869_p5 }
  0x44   : > { %636 = vst [vmem:[%s368_s13 + $0x10] sm:$0xff] %v426_v34 }
  0x45   : > { %v408_v37 = vadd.f32 %v407_v33, %v405_v26  ;;  %v419_v38 = vadd.f32 %v418_v35, %v416_v30  ;;  %v433_v39 = vadd.f32 %v432_v36, %v396_v23  ;;  %p875_p13 = pnand %p874_p10, %p870_p6 }
  0x47   : > { %410 = vst [vmem:[%s368_s13] sm:$0xff] %v408_v37 }
  0x48   : > { %634 = vst [vmem:[%s368_s13 + $0x8] sm:$0xff] %v419_v38 }
  0x49   : > { %638 = vst [vmem:[%s368_s13 + $0x18] sm:$0xff] %v433_v39 }
  0x4a   : > { %878 = shalt.err (!%p875_p13)
}
  0x4b   : > { %s945_s0 = smov 128   ;;  %s946_s17 = smov 8  }
  0x4c   : > { %657 = dma.vmem_to_hbm [thread:$0]  (%p1027_p9), %s450_s18, 512, %s452_s22, %s437_s11, %s945_s0, %s945_s0, %s946_s17  }
  0x4d PF: > { %s1195_s20 = sld [smem:[#allocation17_spill]]  ;;  %s466_s5 = sand.u32 1, %s921_s15  }
  0x4e   : > { %p673_p0 = pnand %p614_p12, %p1034_p11  ;;  %s467_s6 = scalar_lea.sflag [#allocation4], %s466_s5 }
  0x50   : > { %p674_p1 = pneg %p673_p0 }
  0x52   : > { %916 = dma.done.wait (%p674_p1), %s467_s6, 512  }
  0x53   : > { %918 = vsyncadd (%p674_p1), %s467_s6, 4294966784  ;;  %s26_s20 = sadd.s32 1, %s1195_s20   ;;  %s1196_s7 = sld [smem:[#allocation15_spill]] }
  0x54   : > { %p23_p2 = scmp.ge.s32.totalorder %s26_s20, 4   ;;  %s1197_s17 = sld [smem:[#allocation19_spill]] }
  0x55   : > { %s1198_s18 = sld [smem:[#allocation16_spill]]  ;;  %s1200_s15 = smov %s925_s16 }
  0x56   : > { %s1199_s19 = sld [smem:[#allocation18_spill]]  ;;  %25 = sbr.rel (!%p23_p2) target bundleno = 13 (0xd), region = 125 }
  0x59   : > { %s1201_s16 = smov %s1196_s7 }
  0x5b   :  { %473 = vsyncpa [#allocation3], 1 }
  0x5c   :  { %475 = vsyncpa [#allocation3 + $0x1], 1 }
  0x5d   :  { %476 = vsyncpa [#allocation6], 1 }
  0x5e   :  { %478 = vsyncpa [#allocation6 + $0x1], 1 }
  0x5f   :  { %479 = vsyncpa [#allocation9], 1 }
  0x60   :  { %481 = vsyncpa [#allocation9 + $0x1], 1 }
  0x61   :  { %482 = vsyncpa [#allocation4], 1 }
  0x62   :  { %484 = vsyncpa [#allocation4 + $0x1], 1 }

</bundles_post_ra>
